<compile_context>
chip_gen: v6e
topology: v6e:2x2x1
jax: 0.10.0
libtpu: 0.0.40
codegen_flags: <defaults>
</compile_context>

<pallas_src>
import jax
import jax.numpy as jnp
from jax.experimental import pallas as pl
from jax.experimental.pallas import tpu as pltpu

LANE = 128
SUBLANE = 8
MAX_BLOCK_ROWS = 4096  # (4096, 128) f32 = 2 MiB per input per pipeline buffer


def _round_up(x, m):
    return ((x + m - 1) // m) * m


def _dice_partial_kernel(t_ref, x_ref, o_ref):
    """Per-block per-lane partial sums.

    Writes one full (8, 128) tile per grid step:
      row 0: sum(sigmoid(x) * t), row 1: sum(sigmoid(x)), row 2: sum(t),
      rows 3..7: zeros (keeps the writeback a single unmasked full-tile store).
    """
    x = x_ref[...].astype(jnp.float32)
    t = t_ref[...].astype(jnp.float32)
    # sigmoid(x) == 0.5 * tanh(0.5 * x) + 0.5 : one EUP push per element.
    p = 0.5 * jnp.tanh(0.5 * x) + 0.5

    pt = jnp.sum(p * t, axis=0, keepdims=True)   # (1, 128)
    ps = jnp.sum(p, axis=0, keepdims=True)       # (1, 128)
    ts = jnp.sum(t, axis=0, keepdims=True)       # (1, 128)
    o_ref[0] = jnp.concatenate(
        [pt, ps, ts, jnp.zeros((SUBLANE - 3, LANE), jnp.float32)], axis=0)


def dice_loss(targets, inputs, smooth=1.0):
    """JAX/Pallas equivalent of DiceLoss.forward(targets, inputs, smooth)."""
    x = inputs.reshape(-1)
    t = targets.reshape(-1)
    n = x.shape[0]
    if n == 0:
        # Empty input: dice = smooth / smooth = 1 -> loss = 0.
        return jnp.float32(0.0)

    # 128-lane-aligned prefix handled by the kernel; everything else (lane
    # remainder and partial last row-block) handled in plain JAX below.
    lane_rem = n % LANE
    n_main = n - lane_rem
    rows_total = n_main // LANE

    # Block-size choice: as large as possible for HBM efficiency (per-step
    # fixed cost amortization), capped at MAX_BLOCK_ROWS for VMEM, and
    # balanced so there are >= 2 blocks whenever possible (v7x megacore).
    if rows_total >= SUBLANE:
        nb_target = max(2, pl.cdiv(rows_total, MAX_BLOCK_ROWS))
        block_rows = min(MAX_BLOCK_ROWS,
                         _round_up(pl.cdiv(rows_total, nb_target), SUBLANE))
        num_blocks = rows_total // block_rows
    else:
        block_rows = 0
        num_blocks = 0

    n_covered = num_blocks * block_rows * LANE  # elements covered by kernel

    inter = jnp.float32(0.0)
    p_sum = jnp.float32(0.0)
    t_sum = jnp.float32(0.0)

    if num_blocks > 0:
        # Reshape (bitcast, no copy) the aligned prefix to (rows, 128).
        if lane_rem:
            x2 = x[:n_main].reshape(rows_total, LANE)
            t2 = t[:n_main].reshape(rows_total, LANE)
        else:
            x2 = x.reshape(rows_total, LANE)
            t2 = t.reshape(rows_total, LANE)

        # The grid only visits the num_blocks fully in-bounds blocks; any
        # partial last block is left to the JAX tail path, so no in-kernel
        # mask and no boundary-garbage handling is needed.
        blk = pl.BlockSpec((block_rows, LANE), lambda i: (i, 0))

        partials = pl.pallas_call(
            _dice_partial_kernel,
            out_shape=jax.ShapeDtypeStruct((num_blocks, SUBLANE, LANE),
                                           jnp.float32),
            grid_spec=pltpu.PrefetchScalarGridSpec(
                num_scalar_prefetch=0,
                grid=(num_blocks,),
                in_specs=[blk, blk],
                out_specs=pl.BlockSpec((1, SUBLANE, LANE),
                                       lambda i: (i, 0, 0)),
            ),
            compiler_params=pltpu.CompilerParams(
                dimension_semantics=("parallel",)),
        )(t2, x2)

        # Tiny cross-block / cross-lane reduction in plain JAX.
        sums = jnp.sum(partials, axis=(0, 2))  # (8,), rows 3..7 are zero
        inter = sums[0]
        p_sum = sums[1]
        t_sum = sums[2]

    if n_covered < n:
        # Tail (partial last block and/or lane remainder): at most
        # block_rows*128 + 127 elements; fused sigmoid + reductions in XLA.
        x_tail = x[n_covered:].astype(jnp.float32)
        t_tail = t[n_covered:].astype(jnp.float32)
        p_tail = jax.nn.sigmoid(x_tail)
        inter = inter + jnp.sum(p_tail * t_tail)
        p_sum = p_sum + jnp.sum(p_tail)
        t_sum = t_sum + jnp.sum(t_tail)

    smooth = jnp.float32(smooth)
    dice = (2.0 * inter + smooth) / (p_sum + t_sum + smooth)
    # TODO(synk): the PyTorch module print()s intersection / inputs.sum() /
    # targets.sum(); host-side prints are intentionally omitted (they do not
    # affect the returned value).
    return 1.0 - dice


def dice_loss_ref(targets, inputs, smooth=1.0):
    """Pure-JAX reference for validation."""
    p = jax.nn.sigmoid(inputs.astype(jnp.float32)).reshape(-1)
    t = targets.astype(jnp.float32).reshape(-1)
    inter = jnp.sum(p * t)
    dice = (2.0 * inter + smooth) / (jnp.sum(p) + jnp.sum(t) + smooth)
    return 1.0 - dice


if __name__ == "__main__":
    key = jax.random.PRNGKey(0)
    k1, k2 = jax.random.split(key)

    # NCHW-shaped example consistent with a segmentation logits / mask pair.
    x_shape = (2, 4, 16, 16)
    inputs = jax.random.normal(k1, x_shape, dtype=jnp.float32)             # logits
    targets = (jax.random.uniform(k2, x_shape) > 0.5).astype(jnp.float32)  # binary mask

    loss = dice_loss(targets, inputs, smooth=1.0)
    loss = jax.block_until_ready(loss)

    ref = dice_loss_ref(targets, inputs, smooth=1.0)
    assert jnp.allclose(loss, ref, rtol=1e-5, atol=1e-5), (loss, ref)

    print("KERNEL_OK")
</pallas_src>

<mosaic_0001>
module attributes {stable_mosaic.version = 11 : i64} {
  func.func @_dice_partial_kernel(%arg0: i32, %arg1: memref<8x128xf32, #tpu.memory_space<vmem>>, %arg2: memref<8x128xf32, #tpu.memory_space<vmem>>, %arg3: memref<1x8x128xf32, #tpu.memory_space<vmem>>) attributes {dimension_semantics = [#tpu.dimension_semantics<parallel>], iteration_bounds = array<i64: 2>, scalar_prefetch = 0 : i64, scratch_operands = 0 : i64, tpu.core_type = #tpu.core_type<tc>, window_params = [{transform_indices = @transform_0, window_bounds = array<i64: 8, 128>}, {transform_indices = @transform_1, window_bounds = array<i64: 8, 128>}, {transform_indices = @transform_2, window_bounds = array<i64: 1, 8, 128>}]} {
    %c0 = arith.constant 0 : index
    %c0_0 = arith.constant 0 : index
    %0 = vector.load %arg2[%c0, %c0_0] : memref<8x128xf32, #tpu.memory_space<vmem>>, vector<8x128xf32>
    %c0_1 = arith.constant 0 : index
    %c0_2 = arith.constant 0 : index
    %1 = vector.load %arg1[%c0_1, %c0_2] : memref<8x128xf32, #tpu.memory_space<vmem>>, vector<8x128xf32>
    %cst = arith.constant 5.000000e-01 : f32
    %2 = vector.broadcast %cst : f32 to vector<8x128xf32>
    %3 = arith.mulf %2, %0 : vector<8x128xf32>
    %4 = math.tanh %3 : vector<8x128xf32>
    %cst_3 = arith.constant 5.000000e-01 : f32
    %5 = vector.broadcast %cst_3 : f32 to vector<8x128xf32>
    %6 = arith.mulf %5, %4 : vector<8x128xf32>
    %cst_4 = arith.constant 5.000000e-01 : f32
    %7 = vector.broadcast %cst_4 : f32 to vector<8x128xf32>
    %8 = arith.addf %6, %7 : vector<8x128xf32>
    %9 = arith.mulf %8, %1 : vector<8x128xf32>
    %cst_5 = arith.constant dense<0.000000e+00> : vector<128xf32>
    %10 = vector.multi_reduction <add>, %9, %cst_5 [0] : vector<8x128xf32> to vector<128xf32>
    %11 = vector.shape_cast %10 : vector<128xf32> to vector<1x128xf32>
    %cst_6 = arith.constant dense<0.000000e+00> : vector<128xf32>
    %12 = vector.multi_reduction <add>, %8, %cst_6 [0] : vector<8x128xf32> to vector<128xf32>
    %13 = vector.shape_cast %12 : vector<128xf32> to vector<1x128xf32>
    %cst_7 = arith.constant dense<0.000000e+00> : vector<128xf32>
    %14 = vector.multi_reduction <add>, %1, %cst_7 [0] : vector<8x128xf32> to vector<128xf32>
    %15 = vector.shape_cast %14 : vector<128xf32> to vector<1x128xf32>
    %cst_8 = arith.constant 0.000000e+00 : f32
    %16 = vector.broadcast %cst_8 : f32 to vector<5x128xf32>
    %17 = tpu.concatenate %11, %13, %15, %16 in 0 : vector<1x128xf32>, vector<1x128xf32>, vector<1x128xf32>, vector<5x128xf32> -> vector<8x128xf32>
    %c0_9 = arith.constant 0 : index
    %c0_10 = arith.constant 0 : index
    %c0_11 = arith.constant 0 : index
    %18 = vector.load %arg3[%c0_9, %c0_10, %c0_11] : memref<1x8x128xf32, #tpu.memory_space<vmem>>, vector<1x8x128xf32>
    %19 = vector.shape_cast %18 : vector<1x8x128xf32> to vector<8x128xf32>
    %20 = vector.shape_cast %17 : vector<8x128xf32> to vector<1x8x128xf32>
    tpu.vector_store %arg3[%c0_9, %c0_10, %c0_11], %20 {strides = array<i32>} : memref<1x8x128xf32, #tpu.memory_space<vmem>>, vector<1x8x128xf32>,
    return
  }
  func.func @transform_0(%arg0: i32) -> (i32, i32) {
    %c0_i32 = arith.constant 0 : i32
    %c0_i32_0 = arith.constant 0 : i32
    return %arg0, %c0_i32 : i32, i32
  }
  func.func @transform_1(%arg0: i32) -> (i32, i32) {
    %c0_i32 = arith.constant 0 : i32
    %c0_i32_0 = arith.constant 0 : i32
    return %arg0, %c0_i32 : i32, i32
  }
  func.func @transform_2(%arg0: i32) -> (i32, i32, i32) {
    %c0_i32 = arith.constant 0 : i32
    %c0_i32_0 = arith.constant 0 : i32
    %c0_i32_1 = arith.constant 0 : i32
    return %arg0, %c0_i32, %c0_i32_0 : i32, i32, i32
  }
}

</mosaic_0001>

<bundles_post_ra>
// kernel: tpu_custom_call.1
= control target key start
LH: loop header
LB: loop body
LE: loop exit
PB: predicated region body
PF: predicated region fallthrough
CT: control target
= control target key end

     0   :  { %7 = vsyncpa [#allocation3], 0  ;;  %s752_s0 = inlined_call_operand.hbm [shape: f32[16,128], index: 0, kind: input, shape index: {}]   ;;  %s753_s1 = inlined_call_operand.hbm [shape: f32[16,128], index: 1, kind: input, shape index: {}]   ;;  %s754_s2 = inlined_call_operand.hbm [shape: f32[2,8,128], index: 2, kind: output, shape index: {}]  }
   0x1   :  { %9 = vsyncpa [#allocation3 + $0x1], 0 }
   0x2   :  { %10 = vsyncpa [#allocation6], 0 }
   0x3   :  { %12 = vsyncpa [#allocation6 + $0x1], 0 }
   0x4   :  { %13 = vsyncpa [#allocation4], 0 }
   0x5   :  { %15 = vsyncpa [#allocation4 + $0x1], 0  ;;  %s547_s9 = smov 0   ;;  %s549_s10 = smov 0  }
   0x6   :  { %s551_s11 = smov 0   ;;  %s553_s12 = smov 0  }
   0x7 LB: > { %s568_s13 = sadd.s32 4294967295, %s527_s12   ;;  %s335_s14 = sadd.s32 4294967294, %s527_s12   ;;  %s527_s12 = sphi %s553_s12, %s773_s12   ;;  %s523_s11 = sphi %s551_s11, %s772_s11   ;;  %s519_s10 = sphi %s549_s10, %s771_s10   ;;  %s515_s9 = sphi %s547_s9, %s770_s9  }
   0x8   : > { %s572_s15 = sadd.s32 1, %s527_s12   ;;  %s28_s16 = sadd.s32 1, %s523_s11 }
   0x9   : > { %s25_s17 = ssub.s32 %s527_s12, %s572_s15  ;;  %p35_p0 = scmp.ne.s32.totalorder %s523_s11, %s519_s10 }
   0xa   : > { %p26_p1 = scmp.eq.s32.totalorder %s25_s17, 0  ;;  %p36_p2 = scmp.eq.s32.totalorder %s527_s12, 0 }
   0xb   : > { %p41_p3 = scmp.ne.s32.totalorder %s519_s10, %s515_s9  ;;  %p42_p4 = scmp.eq.s32.totalorder %s568_s13, 0 }
   0xc   : > { %s584_s18 = scalar_select %p26_p1, %s523_s11, %s28_s16  }
   0xd   : > { %p586_p5 = por %p36_p2, %p35_p0  ;;  %p590_p6 = por %p42_p4, %p41_p3 }
   0xe   : > { %p91_p7 = scmp.eq.s32.totalorder %s568_s13, 1  ;;  %p97_p8 = scmp.eq.s32.totalorder %s335_s14, 1 }
   0xf   : > { %s758_s20 = scalar_select %p590_p6, 1, 0 }
  0x10   : > { %p367_p10 = scmp.lt.s32.totalorder %s527_s12, 2  ;;  %p597_p11 = por %p91_p7, %p35_p0 }
  0x11   : > { %p601_p12 = por %p97_p8, %p41_p3  ;;  %s606_s23 = sand.u32 1, %s523_s11  }
  0x12   : > { %s759_s21 = scalar_select %p597_p11, 1, 0 }
  0x13   : > { %s760_s22 = scalar_select %p601_p12, 1, 0 }
  0x14   : > { %s339_s24 = sshll.u32 %s527_s12, 7  ;;  %s338_s25 = sshll.u32 %s606_s23, 3 }
  0x15   : > { %s615_s28 = scalar_lea.hbm %s752_s0, %s339_s24  ;;  %s121_s29 = scalar_lea.vmem [#allocation2], %s338_s25 }
  0x16   : > { %s128_s30 = sshll.u32 %s121_s29, 4  ;;  %p621_p13 = pnand %p367_p10, %p586_p5  ;;  %s625_s30 = int_to_ptr.vmem [resolvable:$true] %s128_s30 }
  0x17   : > { %s118_s4 = scalar_lea.sflag [#allocation3], %s606_s23  ;;  %s403_s5 = scalar_lea.hbm %s615_s28, 128 }
  0x18   : > { %p404_p2 = scmp.ne.s32.totalorder %s615_s28, %s403_s5  ;;  %p405_p3 = pneg %p621_p13 }
  0x19   : > { %s408_s8 = scalar_lea.hbm %s752_s0, 256  ;;  %p409_p5 = scmp.lt.s32.totalorder %s615_s28, %s752_s0 }
  0x1a   : > { %p406_p4 = pnand %p405_p3, %p404_p2  ;;  %p410_p8 = scmp.lt.s32.totalorder %s408_s8, %s403_s5 }
  0x1c   : > { %p407_p7 = pneg %p406_p4  ;;  %p411_p10 = por %p410_p8, %p409_p5 }
  0x1e   : > { %p412_p9 = pnand %p411_p10, %p407_p7 }
  0x20   : > { %415 = shalt.err (!%p412_p9)
}
  0x21   : > { %s416_s17 = scalar_lea.vmem %s625_s30, 128  ;;  %s529_s19 = smov [#allocation2]  }
  0x22   : > { %p417_p0 = scmp.ne.s32.totalorder %s625_s30, %s416_s17  ;;  %s421_s26 = sshll.u32 %s529_s19, 4  ;;  %s422_s26 = int_to_ptr.vmem [resolvable:$false] %s421_s26 }
  0x23   : > { %s423_s27 = scalar_lea.vmem %s422_s26, 256  ;;  %p424_p1 = scmp.lt.s32.totalorder %s625_s30, %s422_s26 }
  0x24   : > { %p419_p2 = pnand %p417_p0, %p405_p3  ;;  %p425_p12 = scmp.lt.s32.totalorder %s423_s27, %s416_s17 }
  0x26   : > { %p420_p4 = pneg %p419_p2  ;;  %p426_p11 = por %p425_p12, %p424_p1 }
  0x28   : > { %p427_p5 = pnand %p426_p11, %p420_p4 }
  0x2a   : > { %430 = shalt.err (!%p427_p5)
}
  0x2b   : > { %359 = dma.hbm_to_vmem [thread:$0]  (!%p621_p13), %s615_s28, 128, %s625_s30, %s118_s4  }
  0x2c   : > { %p762_p9 = scmp.lt.s32.totalorder %s527_s12, 3  ;;  %p763_p0 = scmp.ge.s32.totalorder %s527_s12, 1 }
  0x2d   : > { %s667_s7 = scalar_lea.hbm %s753_s1, %s339_s24  ;;  %s139_s8 = scalar_lea.vmem [#allocation5], %s338_s25 }
  0x2e   : > { %p658_p7 = pnand %p763_p0, %p762_p9  ;;  %s146_s14 = sshll.u32 %s139_s8, 4  ;;  %s147_s14 = int_to_ptr.vmem [resolvable:$true] %s146_s14 }
  0x2f   : > { %s136_s28 = scalar_lea.sflag [#allocation6], %s606_s23  ;;  %s431_s30 = scalar_lea.hbm %s667_s7, 128 }
  0x30   : > { %s764_s29 = scalar_select %p658_p7, 1, 0 }
  0x31   : > { %p432_p11 = scmp.ne.s32.totalorder %s667_s7, %s431_s30  ;;  %s436_s17 = scalar_lea.hbm %s753_s1, 256 }
  0x32   : > { %p437_p8 = scmp.lt.s32.totalorder %s667_s7, %s753_s1  ;;  %p438_p10 = scmp.lt.s32.totalorder %s436_s17, %s431_s30 }
  0x33   : > { %p434_p12 = pnand %p432_p11, %p405_p3 }
  0x34   : > { %p439_p2 = por %p438_p10, %p437_p8 }
  0x35   : > { %p435_p1 = pneg %p434_p12 }
  0x37   : > { %p440_p4 = pnand %p439_p2, %p435_p1 }
  0x39   : > { %443 = shalt.err (!%p440_p4)
}
  0x3a   : > { %s444_s25 = scalar_lea.vmem %s147_s14, 128  ;;  %s530_s23 = smov [#allocation5]  }
  0x3b   : > { %p445_p5 = scmp.ne.s32.totalorder %s147_s14, %s444_s25  ;;  %s449_s26 = sshll.u32 %s530_s23, 4  ;;  %s450_s26 = int_to_ptr.vmem [resolvable:$false] %s449_s26 }
  0x3c   : > { %s451_s27 = scalar_lea.vmem %s450_s26, 256  ;;  %p452_p11 = scmp.lt.s32.totalorder %s147_s14, %s450_s26 }
  0x3d   : > { %p447_p9 = pnand %p445_p5, %p405_p3  ;;  %p453_p12 = scmp.lt.s32.totalorder %s451_s27, %s444_s25 }
  0x3f   : > { %p448_p0 = pneg %p447_p9  ;;  %p454_p6 = por %p453_p12, %p452_p11 }
  0x41   : > { %p455_p7 = pnand %p454_p6, %p448_p0 }
  0x43   : > { %458 = shalt.err (!%p455_p7)
}
  0x44   : > { %362 = dma.hbm_to_vmem [thread:$0]  (!%p621_p13), %s667_s7, 128, %s147_s14, %s136_s28  }
  0x45   : > { %p765_p1 = scmp.ne.s32.totalorder %s764_s29, 0 }
  0x46   : > { %s693_s5 = sand.u32 (!%p765_p1), 1, %s519_s10   ;;  %p766_p6 = scmp.ne.s32.totalorder (!%p765_p1), %s758_s20, 0 }
  0x47   : > { %155 = sbr.rel (%p765_p1) target bundleno = 130 (0x82), region = 28  ;;  %s696_s6 = sshll.u32 (!%p765_p1), %s693_s5, 3 }
  0x48   : > { %s158_s8 = scalar_lea.sflag (!%p765_p1), [#allocation3], %s693_s5  ;;  %s161_s30 = scalar_lea.vmem (!%p765_p1), [#allocation2], %s696_s6 }
  0x4c   : > { %502 = dma.done.wait (%p766_p6), %s158_s8, 128  }
  0x4d   : > { %504 = vsyncadd (%p766_p6), %s158_s8, 4294967168  ;;  %s167_s3 = scalar_lea.sflag [#allocation6], %s693_s5  ;;  %s170_s29 = scalar_lea.vmem [#allocation5], %s696_s6 }
  0x4e   : > { %506 = dma.done.wait (%p766_p6), %s167_s3, 128  }
  0x4f   : > { %508 = vsyncadd (%p766_p6), %s167_s3, 4294967168  ;;  %v196_v0 = vld [vmem:[%s170_s29] sm:$0xff]  ;;  %v197_v2 = vld [vmem:[%s161_s30] sm:$0xff]  ;;  %vm221_vm0 = vcmask 1040384   ;;  %vm223_vm1 = vcmask 1041408   ;;  %s195_s20 = scalar_lea.vmem [#allocation7], %s696_s6 }
  0x50   : > { %v198_v1 = vmul.f32 0.5, %v196_v0  ;;  %v215_v3 = vrot.slane %v197_v2, 4  ;;  %s242_s7 = sshll.u32 %s195_s20, 4  ;;  %s347_s14 = sshll.u32 %s568_s13, 7  ;;  %vm225_vm2 = vcmask 1042432   ;;  %s712_s7 = int_to_ptr.vmem [resolvable:$true] %s242_s7 }
  0x51   : > { %s240_s16 = scalar_lea.hbm %s754_s2, %s347_s14  ;;  %s229_s17 = scalar_lea.sflag [#allocation4], %s693_s5 }
  0x52   : > { %401 = vtanh.f32 %v198_v1  ;;  %v216_v5 = vadd.f32 %v215_v3, %v197_v2  ;;  %s459_s24 = scalar_lea.vmem %s712_s7, 128  ;;  %p767_p3 = scmp.ne.s32.totalorder %s759_s21, 0 }
  0x53   : > { %p460_p13 = scmp.ne.s32.totalorder %s712_s7, %s459_s24  ;;  %s531_s13 = smov [#allocation7]  }
  0x54   : > { %v217_v8 = vrot.slane %v216_v5, 2  ;;  %s463_s19 = sshll.u32 %s531_s13, 4  ;;  %s464_s19 = int_to_ptr.vmem [resolvable:$false] %s463_s19 }
  0x55   : > { %p461_p7 = pnand %p460_p13, %p767_p3  ;;  %s465_s25 = scalar_lea.vmem %s464_s19, 256 }
  0x56   : > { %v218_v13 = vadd.f32 %v217_v8, %v216_v5  ;;  %p466_p10 = scmp.lt.s32.totalorder %s712_s7, %s464_s19  ;;  %p467_p2 = scmp.lt.s32.totalorder %s465_s25, %s459_s24 }
  0x57   : > { %p462_p8 = pneg %p461_p7 }
  0x58   : > { %v219_v18 = vrot.slane %v218_v13, 1  ;;  %p468_p4 = por %p467_p2, %p466_p10 }
  0x5a   : > { %v220_v23 = vadd.f32 %v219_v18, %v218_v13  ;;  %p469_p5 = pnand %p468_p4, %p462_p8 }
  0x5f   : > { %v402_v4 = vpop.eup %401 }
  0x60   : > { %v200_v6 = vmul.f32 0.5, %v402_v4 }
  0x62   : > { %v201_v7 = vadd.f32 0.5, %v200_v6 }
  0x64   : > { %v202_v9 = vmul.f32 %v201_v7, %v197_v2  ;;  %v209_v10 = vrot.slane %v201_v7, 4 }
  0x66   : > { %v203_v11 = vrot.slane %v202_v9, 4  ;;  %v210_v12 = vadd.f32 %v209_v10, %v201_v7 }
  0x68   : > { %v204_v14 = vadd.f32 %v203_v11, %v202_v9  ;;  %v211_v15 = vrot.slane %v210_v12, 2 }
  0x6a   : > { %v205_v16 = vrot.slane %v204_v14, 2  ;;  %v212_v17 = vadd.f32 %v211_v15, %v210_v12 }
  0x6c   : > { %v206_v19 = vadd.f32 %v205_v16, %v204_v14  ;;  %v213_v20 = vrot.slane %v212_v17, 1 }
  0x6e   : > { %v207_v21 = vrot.slane %v206_v19, 1  ;;  %v214_v22 = vadd.f32 %v213_v20, %v212_v17 }
  0x70   : > { %v208_v24 = vadd.f32 %v207_v21, %v206_v19 }
  0x72   : > { %v222_v25 = vsel %vm221_vm0, %v208_v24, %v214_v22 }
  0x73   : > { %v224_v26 = vsel %vm223_vm1, %v222_v25, %v220_v23 }
  0x74   : > { %v226_v27 = vsel %vm225_vm2, %v224_v26, 0.0 }
  0x75   : > { %227 = vst [vmem:[%s195_s20] sm:$0xff] %v226_v27 }
  0x76   : > { %472 = shalt.err (!%p469_p5)
}
  0x77   : > { %s473_s23 = scalar_lea.hbm %s240_s16, 128  ;;  %s477_s5 = scalar_lea.hbm %s754_s2, 256 }
  0x78   : > { %p474_p9 = scmp.ne.s32.totalorder %s240_s16, %s473_s23  ;;  %p478_p12 = scmp.lt.s32.totalorder %s240_s16, %s754_s2 }
  0x79   : > { %p479_p1 = scmp.lt.s32.totalorder %s477_s5, %s473_s23 }
  0x7a   : > { %p475_p0 = pnand %p474_p9, %p767_p3 }
  0x7b   : > { %p480_p6 = por %p479_p1, %p478_p12 }
  0x7c   : > { %p476_p11 = pneg %p475_p0 }
  0x7e   : > { %p481_p13 = pnand %p480_p6, %p476_p11 }
  0x80   : > { %484 = shalt.err (!%p481_p13)
}
  0x81   : > { %354 = dma.vmem_to_hbm [thread:$0]  (%p767_p3), %s712_s7, 128, %s240_s16, %s229_s17  }
  0x82 PF: > { %s254_s30 = sand.u32 1, %s515_s9   ;;  %p768_p7 = scmp.ne.s32.totalorder %s760_s22, 0 }
  0x83   : > { %p769_p8 = scmp.ge.s32.totalorder %s527_s12, 2  ;;  %s255_s3 = scalar_lea.sflag [#allocation4], %s254_s30 }
  0x85   : > { %p364_p10 = pnand %p769_p8, %p768_p7 }
  0x87   : > { %p365_p2 = pneg %p364_p10 }
  0x89   : > { %510 = dma.done.wait (%p365_p2), %s255_s3, 128  }
  0x8a   : > { %512 = vsyncadd (%p365_p2), %s255_s3, 4294967168  ;;  %p18_p4 = scmp.ge.s32.totalorder %s572_s15, 4   ;;  %s770_s9 = smov %s519_s10 }
  0x8b   : > { %s771_s10 = smov %s523_s11  ;;  %s772_s11 = smov %s584_s18 }
  0x8c   : > { %s773_s12 = smov %s572_s15  ;;  %20 = sbr.rel (!%p18_p4) target bundleno = 7 (0x7), region = 86 }
  0x91   :  { %260 = vsyncpa [#allocation3], 1 }
  0x92   :  { %262 = vsyncpa [#allocation3 + $0x1], 1 }
  0x93   :  { %263 = vsyncpa [#allocation6], 1 }
  0x94   :  { %265 = vsyncpa [#allocation6 + $0x1], 1 }
  0x95   :  { %266 = vsyncpa [#allocation4], 1 }
  0x96   :  { %268 = vsyncpa [#allocation4 + $0x1], 1 }

</bundles_post_ra>
